<compile_context>
chip_gen: v5e
topology: v5e:2x2
jax: 0.10.0
libtpu: 0.0.40
codegen_flags: <defaults>
</compile_context>

<pallas_src>
import math

import jax
import jax.numpy as jnp
from jax.experimental import pallas as pl
from jax.experimental.pallas import tpu as pltpu


# ------------------------------------------------------------------ utilities
def _round_up(x, m):
    return (x + m - 1) // m * m


def _pick_tile(n, candidates):
    for c in candidates:
        if n >= c and n % c == 0:
            return c
    return n


def _vmem_limit_bytes(varying_bytes, resident_bytes):
    """Scoped-VMEM request: double-buffer only grid-varying blocks, count
    grid-invariant blocks / scratch / temporaries once, add headroom, and cap
    below the physical VMEM of the current chip (64 MiB on v7x)."""
    try:
        cap = int(pltpu.get_tpu_info().vmem_capacity_bytes) - (8 << 20)
    except Exception:  # interpret mode / older jax: assume the smallest chip
        cap = 56 << 20
    cap = max(32 << 20, cap)
    need = 2 * int(varying_bytes) + int(resident_bytes) + (4 << 20)
    return int(min(cap, max(16 << 20, need)))


# ------------------------------------------------------------- kernel 1: QKV
def _qkv_proj_kernel(xq_ref, xk_ref, xv_ref, w_ref, b_ref, q_ref, k_ref, v_ref):
    # xq/xk/xv: [TM, D] f32 row tiles; w: [3, D, D] bf16; b: [3, 1, D] f32.
    # f32 activations are cast to bf16 in-kernel; f32 MXU accumulation + bias.
    def proj(x_ref, idx, o_ref):
        acc = jnp.dot(x_ref[...].astype(jnp.bfloat16), w_ref[idx],
                      preferred_element_type=jnp.float32)
        o_ref[...] = (acc + b_ref[idx]).astype(o_ref.dtype)

    proj(xq_ref, 0, q_ref)
    proj(xk_ref, 1, k_ref)
    proj(xv_ref, 2, v_ref)


# ---------------------------------------------------- kernel 2: flash attention
def _mha_kernel(mask_ref, q_ref, k_ref, v_ref, wo_ref, bo_ref, out_ref,
                m_sc, l_sc, acc_sc):
    ki = pl.program_id(2)

    @pl.when(ki == 0)
    def _init():
        m_sc[...] = jnp.full(m_sc.shape, -jnp.inf, m_sc.dtype)
        l_sc[...] = jnp.zeros(l_sc.shape, l_sc.dtype)
        acc_sc[...] = jnp.zeros(acc_sc.shape, acc_sc.dtype)

    q = q_ref[0]                      # [H, TQ, dk] bf16, pre-scaled by 1/sqrt(dk)
    k = k_ref[0]                      # [H, TK, dk] bf16
    v = v_ref[0]                      # [H, TK, dk] bf16

    # All heads in one batched (leading-head) MXU contraction, f32 accumulation.
    s = jnp.einsum("hqd,hkd->hqk", q, k,
                   preferred_element_type=jnp.float32)            # [H,TQ,TK]

    # Additive mask bias: one compare+select per kv tile, broadcast over H, TQ.
    bias = jnp.where(mask_ref[0] == 0.0, -1e9, 0.0)               # [1, TK]
    s = s + bias[None]

    # Online (flash) softmax update in f32.
    m_prev = m_sc[...]                                            # [H,TQ,1]
    m_new = jnp.maximum(m_prev, jnp.max(s, axis=-1, keepdims=True))
    alpha = jnp.exp(m_prev - m_new)                               # [H,TQ,1]
    p = jnp.exp(s - m_new)                                        # [H,TQ,TK]
    l_sc[...] = alpha * l_sc[...] + jnp.sum(p, axis=-1, keepdims=True)
    pv = jnp.einsum("hqk,hkd->hqd", p.astype(jnp.bfloat16), v,
                    preferred_element_type=jnp.float32)           # [H,TQ,dk]
    acc_sc[...] = alpha * acc_sc[...] + pv
    m_sc[...] = m_new

    @pl.when(ki == pl.num_programs(2) - 1)
    def _finalize():
        inv_l = pl.reciprocal(l_sc[...], approx=True)             # EUP slot
        ctx = (acc_sc[...] * inv_l).astype(jnp.bfloat16)          # [H,TQ,dk]
        # Fused output projection: batched head-leading MXU contraction then a
        # cheap VPU reduce over heads (no serial per-head accumulation chain;
        # a single (h,d)-contracting dot_general is not reliably lowered).
        outs = jnp.einsum("hqd,hdn->hqn", ctx, wo_ref[...],
                          preferred_element_type=jnp.float32)     # [H,TQ,D]
        out_ref[0] = (jnp.sum(outs, axis=0) + bo_ref[...]).astype(out_ref.dtype)


# ------------------------------------------------------------------- wrapper
def multi_headed_attention(query, key, value, mask, params, *, n_heads):
    """Forward pass of MultiHeadedAttention (dropout = identity, eval mode).

    query/key/value: [B, S, D] f32 (same S assumed for query and key/value).
    mask:            [B, 1, S] (0 = masked key position) or None.
    params:          weights stored as [in, out] (= torch weight.T), biases [1, D].
    """
    B, S, D = query.shape
    assert key.shape == (B, S, D) and value.shape == (B, S, D), \
        "kernel assumes a single sequence length for query and key/value"
    assert D % n_heads == 0
    H = n_heads
    dk = D // n_heads
    scale = 1.0 / math.sqrt(dk)

    if mask is None:
        mask = jnp.ones((B, 1, S), jnp.float32)
    mask = mask.astype(jnp.float32)

    # Pad the sequence axis so attention tiles are (8,128)-friendly; padded key
    # positions are masked out and padded query rows are sliced off at the end.
    Sp = _round_up(S, 128) if S > 128 else _round_up(S, 8)
    if Sp != S:
        pad = Sp - S
        query = jnp.pad(query, ((0, 0), (0, pad), (0, 0)))
        key = jnp.pad(key, ((0, 0), (0, pad), (0, 0)))
        value = jnp.pad(value, ((0, 0), (0, pad), (0, 0)))
        mask = jnp.pad(mask, ((0, 0), (0, 0), (0, pad)))

    # ================= stage 1: fused Q/K/V projections =======================
    BS = B * Sp
    xq = query.reshape(BS, D)
    xk = key.reshape(BS, D)
    xv = value.reshape(BS, D)
    # 1/sqrt(dk) folded into the Q projection (removes a pass over the scores).
    w3 = jnp.stack([params["wq"] * scale, params["wk"],
                    params["wv"]]).astype(jnp.bfloat16)            # [3,D,D]
    b3 = jnp.stack([params["bq"] * scale, params["bk"],
                    params["bv"]]).astype(jnp.float32)             # [3,1,D]

    TM = _pick_tile(BS, (512, 256, 128))
    vmem1 = _vmem_limit_bytes(
        varying_bytes=3 * TM * D * 4 + 3 * TM * D * 2,             # x tiles + outs
        resident_bytes=3 * D * D * 2 + 3 * D * 4 + 3 * TM * D * 6)  # w,b,temps
    q2d, k2d, v2d = pl.pallas_call(
        _qkv_proj_kernel,
        out_shape=tuple(jax.ShapeDtypeStruct((BS, D), jnp.bfloat16)
                        for _ in range(3)),
        grid_spec=pltpu.PrefetchScalarGridSpec(
            num_scalar_prefetch=0,
            grid=(BS // TM,),
            in_specs=[
                pl.BlockSpec((TM, D), lambda i: (i, 0)),       # query rows (f32)
                pl.BlockSpec((TM, D), lambda i: (i, 0)),       # key rows
                pl.BlockSpec((TM, D), lambda i: (i, 0)),       # value rows
                pl.BlockSpec((3, D, D), lambda i: (0, 0, 0)),  # weights (resident)
                pl.BlockSpec((3, 1, D), lambda i: (0, 0, 0)),  # biases (resident)
            ],
            out_specs=[pl.BlockSpec((TM, D), lambda i: (i, 0)) for _ in range(3)],
        ),
        compiler_params=pltpu.CompilerParams(
            dimension_semantics=("parallel",),
            vmem_limit_bytes=vmem1),
    )(xq, xk, xv, w3, b3)

    # Head split: reshape is free; one bf16 relayout to head-major in XLA.
    # TODO(synk): remove this transpose by consuming [B, S, H, dk] blocks in
    # stage 2 once non-leading batch dims lower reliably (head-major stage-1
    # stores would be lane-sparse for dk < 128, so that path is avoided here).
    q, k, v = (t.reshape(B, Sp, H, dk).transpose(0, 2, 1, 3)
               for t in (q2d, k2d, v2d))                           # [B,H,Sp,dk]

    # ============ stage 2: flash attention + fused output projection ==========
    wo_h = params["wo"].reshape(H, dk, D).astype(jnp.bfloat16)     # [H,dk,D]
    bo = params["bo"].astype(jnp.float32)                          # [1,D]

    TQ = _pick_tile(Sp, (256, 128))
    TK = _pick_tile(Sp, (512, 256, 128))
    vmem2 = _vmem_limit_bytes(
        varying_bytes=(TK * 4                  # mask tile
                       + H * TQ * dk * 2       # q tile
                       + 2 * H * TK * dk * 2   # streamed k + v tiles
                       + TQ * D * 4),          # out tile
        resident_bytes=(D * D * 2 + D * 4                          # wo, bo
                        + H * TQ * (2 + dk) * 4                    # m, l, acc
                        + 2 * H * TQ * TK * 4                      # scores + exp
                        + H * TQ * dk * 4                          # pv partial
                        + H * TQ * D * 4))                         # finalize temp

    out = pl.pallas_call(
        _mha_kernel,
        out_shape=jax.ShapeDtypeStruct((B, Sp, D), jnp.float32),
        grid_spec=pltpu.PrefetchScalarGridSpec(
            num_scalar_prefetch=0,
            grid=(B, Sp // TQ, Sp // TK),
            in_specs=[
                pl.BlockSpec((1, 1, TK), lambda b, qi, ki: (b, 0, ki)),         # mask
                pl.BlockSpec((1, H, TQ, dk), lambda b, qi, ki: (b, 0, qi, 0)),  # q
                pl.BlockSpec((1, H, TK, dk), lambda b, qi, ki: (b, 0, ki, 0)),  # k
                pl.BlockSpec((1, H, TK, dk), lambda b, qi, ki: (b, 0, ki, 0)),  # v
                pl.BlockSpec((H, dk, D), lambda b, qi, ki: (0, 0, 0)),          # wo
                pl.BlockSpec((1, D), lambda b, qi, ki: (0, 0)),                 # bo
            ],
            out_specs=pl.BlockSpec((1, TQ, D), lambda b, qi, ki: (b, qi, 0)),
            scratch_shapes=[
                pltpu.VMEM((H, TQ, 1), jnp.float32),    # running max  m
                pltpu.VMEM((H, TQ, 1), jnp.float32),    # running sum  l
                pltpu.VMEM((H, TQ, dk), jnp.float32),   # unnormalized context
            ]),
        compiler_params=pltpu.CompilerParams(
            dimension_semantics=("parallel", "parallel", "arbitrary"),
            vmem_limit_bytes=vmem2),
    )(mask, q, k, v, wo_h, bo)

    return out[:, :S, :] if Sp != S else out


# ----------------------------------------------------------- pure-JAX reference
def mha_reference(query, key, value, mask, params, *, n_heads):
    B, S, D = query.shape
    dk = D // n_heads

    def lin(x, w, b):
        return jnp.einsum("bsd,de->bse", x, w) + b

    def split(x):
        return x.reshape(B, -1, n_heads, dk).transpose(0, 2, 1, 3)

    q = split(lin(query, params["wq"], params["bq"]))
    k = split(lin(key, params["wk"], params["bk"]))
    v = split(lin(value, params["wv"], params["bv"]))
    scores = jnp.einsum("bhqd,bhkd->bhqk", q, k) / math.sqrt(dk)
    scores = jnp.where(mask[:, :, None, :] == 0, -1e9, scores)    # masked_fill
    p = jax.nn.softmax(scores, axis=-1)                           # dropout = identity
    ctx = jnp.einsum("bhqk,bhkd->bhqd", p, v).transpose(0, 2, 1, 3).reshape(B, S, D)
    return jnp.einsum("bsd,de->bse", ctx, params["wo"]) + params["bo"]


# -------------------------------------------------------------------- params
def make_params(key, d_model):
    ks = jax.random.split(key, 8)
    bound = 1.0 / math.sqrt(d_model)

    def u(k, shape):
        return jax.random.uniform(k, shape, jnp.float32, -bound, bound)

    return {
        "wq": u(ks[0], (d_model, d_model)), "bq": u(ks[1], (1, d_model)),
        "wk": u(ks[2], (d_model, d_model)), "bk": u(ks[3], (1, d_model)),
        "wv": u(ks[4], (d_model, d_model)), "bv": u(ks[5], (1, d_model)),
        "wo": u(ks[6], (d_model, d_model)), "bo": u(ks[7], (1, d_model)),
    }


if __name__ == "__main__":
    B, S, D, H = 2, 8, 32, 4

    root = jax.random.PRNGKey(0)
    kq, kk, kv, kp = jax.random.split(root, 4)
    query = jax.random.normal(kq, (B, S, D), jnp.float32)
    key = jax.random.normal(kk, (B, S, D), jnp.float32)
    value = jax.random.normal(kv, (B, S, D), jnp.float32)
    # src-style padding mask: last two key positions of batch element 1 are padding.
    mask = jnp.ones((B, 1, S), jnp.float32).at[1, 0, S - 2:].set(0.0)
    params = make_params(kp, D)

    out = multi_headed_attention(query, key, value, mask, params, n_heads=H)
    out = jax.block_until_ready(out)

    ref = mha_reference(query, key, value, mask, params, n_heads=H)
    assert out.shape == (B, S, D)
    # bf16 matmul operands (f32 accumulation) + approx reciprocal => loose tolerance
    assert jnp.allclose(out, ref, rtol=2e-2, atol=2e-2), "mismatch vs JAX reference"
    print("KERNEL_OK")
</pallas_src>

<mosaic_0001>
module attributes {stable_mosaic.version = 11 : i64} {
  func.func @_qkv_proj_kernel(%arg0: i32, %arg1: memref<16x32xf32, #tpu.memory_space<vmem>>, %arg2: memref<16x32xf32, #tpu.memory_space<vmem>>, %arg3: memref<16x32xf32, #tpu.memory_space<vmem>>, %arg4: memref<3x32x32xbf16, #tpu.memory_space<vmem>>, %arg5: memref<3x1x32xf32, #tpu.memory_space<vmem>>, %arg6: memref<16x32xbf16, #tpu.memory_space<vmem>>, %arg7: memref<16x32xbf16, #tpu.memory_space<vmem>>, %arg8: memref<16x32xbf16, #tpu.memory_space<vmem>>) attributes {dimension_semantics = [#tpu.dimension_semantics<parallel>], iteration_bounds = array<i64: 1>, scalar_prefetch = 0 : i64, scratch_operands = 0 : i64, tpu.core_type = #tpu.core_type<tc>, window_params = [{transform_indices = @transform_0, window_bounds = array<i64: 16, 32>}, {transform_indices = @transform_1, window_bounds = array<i64: 16, 32>}, {transform_indices = @transform_2, window_bounds = array<i64: 16, 32>}, {pipeline_mode = #tpu.pipeline_mode<synchronous>, transform_indices = @transform_3, window_bounds = array<i64: 3, 32, 32>}, {pipeline_mode = #tpu.pipeline_mode<synchronous>, transform_indices = @transform_4, window_bounds = array<i64: 3, 1, 32>}, {transform_indices = @transform_5, window_bounds = array<i64: 16, 32>}, {transform_indices = @transform_6, window_bounds = array<i64: 16, 32>}, {transform_indices = @transform_7, window_bounds = array<i64: 16, 32>}]} {
    %c0 = arith.constant 0 : index
    %c0_0 = arith.constant 0 : index
    %0 = vector.load %arg1[%c0, %c0_0] : memref<16x32xf32, #tpu.memory_space<vmem>>, vector<16x32xf32>
    %1 = arith.truncf %0 : vector<16x32xf32> to vector<16x32xbf16>
    %c0_1 = arith.constant 0 : index
    %c0_2 = arith.constant 0 : index
    %c0_3 = arith.constant 0 : index
    %2 = vector.load %arg4[%c0_1, %c0_2, %c0_3] : memref<3x32x32xbf16, #tpu.memory_space<vmem>>, vector<1x32x32xbf16>
    %3 = vector.shape_cast %2 : vector<1x32x32xbf16> to vector<32x32xbf16>
    %cst = arith.constant dense<0.000000e+00> : vector<16x32xf32>
    %4 = tpu.matmul %1, %3, %cst {dimension_numbers = #tpu.dot_dimension_numbers<[1], [0], [0], [1], [0, 0, 1, 1], [], []>} : vector<16x32xbf16>, vector<32x32xbf16>, vector<16x32xf32> -> vector<16x32xf32>
    %c0_4 = arith.constant 0 : index
    %c0_5 = arith.constant 0 : index
    %c0_6 = arith.constant 0 : index
    %5 = vector.load %arg5[%c0_4, %c0_5, %c0_6] : memref<3x1x32xf32, #tpu.memory_space<vmem>>, vector<1x1x32xf32>
    %6 = vector.shape_cast %5 : vector<1x1x32xf32> to vector<1x32xf32>
    %7 = vector.broadcast %6 : vector<1x32xf32> to vector<16x32xf32>
    %8 = arith.addf %4, %7 : vector<16x32xf32>
    %9 = arith.truncf %8 : vector<16x32xf32> to vector<16x32xbf16>
    %c0_7 = arith.constant 0 : index
    %c0_8 = arith.constant 0 : index
    %10 = vector.load %arg6[%c0_7, %c0_8] : memref<16x32xbf16, #tpu.memory_space<vmem>>, vector<16x32xbf16>
    tpu.vector_store %arg6[%c0_7, %c0_8], %9 {strides = array<i32>} : memref<16x32xbf16, #tpu.memory_space<vmem>>, vector<16x32xbf16>,
    %c0_9 = arith.constant 0 : index
    %c0_10 = arith.constant 0 : index
    %11 = vector.load %arg2[%c0_9, %c0_10] : memref<16x32xf32, #tpu.memory_space<vmem>>, vector<16x32xf32>
    %12 = arith.truncf %11 : vector<16x32xf32> to vector<16x32xbf16>
    %c1 = arith.constant 1 : index
    %c0_11 = arith.constant 0 : index
    %c0_12 = arith.constant 0 : index
    %13 = vector.load %arg4[%c1, %c0_11, %c0_12] : memref<3x32x32xbf16, #tpu.memory_space<vmem>>, vector<1x32x32xbf16>
    %14 = vector.shape_cast %13 : vector<1x32x32xbf16> to vector<32x32xbf16>
    %cst_13 = arith.constant dense<0.000000e+00> : vector<16x32xf32>
    %15 = tpu.matmul %12, %14, %cst_13 {dimension_numbers = #tpu.dot_dimension_numbers<[1], [0], [0], [1], [0, 0, 1, 1], [], []>} : vector<16x32xbf16>, vector<32x32xbf16>, vector<16x32xf32> -> vector<16x32xf32>
    %c1_14 = arith.constant 1 : index
    %c0_15 = arith.constant 0 : index
    %c0_16 = arith.constant 0 : index
    %16 = vector.load %arg5[%c1_14, %c0_15, %c0_16] : memref<3x1x32xf32, #tpu.memory_space<vmem>>, vector<1x1x32xf32>
    %17 = vector.shape_cast %16 : vector<1x1x32xf32> to vector<1x32xf32>
    %18 = vector.broadcast %17 : vector<1x32xf32> to vector<16x32xf32>
    %19 = arith.addf %15, %18 : vector<16x32xf32>
    %20 = arith.truncf %19 : vector<16x32xf32> to vector<16x32xbf16>
    %c0_17 = arith.constant 0 : index
    %c0_18 = arith.constant 0 : index
    %21 = vector.load %arg7[%c0_17, %c0_18] : memref<16x32xbf16, #tpu.memory_space<vmem>>, vector<16x32xbf16>
    tpu.vector_store %arg7[%c0_17, %c0_18], %20 {strides = array<i32>} : memref<16x32xbf16, #tpu.memory_space<vmem>>, vector<16x32xbf16>,
    %c0_19 = arith.constant 0 : index
    %c0_20 = arith.constant 0 : index
    %22 = vector.load %arg3[%c0_19, %c0_20] : memref<16x32xf32, #tpu.memory_space<vmem>>, vector<16x32xf32>
    %23 = arith.truncf %22 : vector<16x32xf32> to vector<16x32xbf16>
    %c2 = arith.constant 2 : index
    %c0_21 = arith.constant 0 : index
    %c0_22 = arith.constant 0 : index
    %24 = vector.load %arg4[%c2, %c0_21, %c0_22] : memref<3x32x32xbf16, #tpu.memory_space<vmem>>, vector<1x32x32xbf16>
    %25 = vector.shape_cast %24 : vector<1x32x32xbf16> to vector<32x32xbf16>
    %cst_23 = arith.constant dense<0.000000e+00> : vector<16x32xf32>
    %26 = tpu.matmul %23, %25, %cst_23 {dimension_numbers = #tpu.dot_dimension_numbers<[1], [0], [0], [1], [0, 0, 1, 1], [], []>} : vector<16x32xbf16>, vector<32x32xbf16>, vector<16x32xf32> -> vector<16x32xf32>
    %c2_24 = arith.constant 2 : index
    %c0_25 = arith.constant 0 : index
    %c0_26 = arith.constant 0 : index
    %27 = vector.load %arg5[%c2_24, %c0_25, %c0_26] : memref<3x1x32xf32, #tpu.memory_space<vmem>>, vector<1x1x32xf32>
    %28 = vector.shape_cast %27 : vector<1x1x32xf32> to vector<1x32xf32>
    %29 = vector.broadcast %28 : vector<1x32xf32> to vector<16x32xf32>
    %30 = arith.addf %26, %29 : vector<16x32xf32>
    %31 = arith.truncf %30 : vector<16x32xf32> to vector<16x32xbf16>
    %c0_27 = arith.constant 0 : index
    %c0_28 = arith.constant 0 : index
    %32 = vector.load %arg8[%c0_27, %c0_28] : memref<16x32xbf16, #tpu.memory_space<vmem>>, vector<16x32xbf16>
    tpu.vector_store %arg8[%c0_27, %c0_28], %31 {strides = array<i32>} : memref<16x32xbf16, #tpu.memory_space<vmem>>, vector<16x32xbf16>,
    return
  }
  func.func @transform_0(%arg0: i32) -> (i32, i32) {
    %c0_i32 = arith.constant 0 : i32
    %c0_i32_0 = arith.constant 0 : i32
    return %arg0, %c0_i32 : i32, i32
  }
  func.func @transform_1(%arg0: i32) -> (i32, i32) {
    %c0_i32 = arith.constant 0 : i32
    %c0_i32_0 = arith.constant 0 : i32
    return %arg0, %c0_i32 : i32, i32
  }
  func.func @transform_2(%arg0: i32) -> (i32, i32) {
    %c0_i32 = arith.constant 0 : i32
    %c0_i32_0 = arith.constant 0 : i32
    return %arg0, %c0_i32 : i32, i32
  }
  func.func @transform_3(%arg0: i32) -> (i32, i32, i32) {
    %c0_i32 = arith.constant 0 : i32
    %c0_i32_0 = arith.constant 0 : i32
    %c0_i32_1 = arith.constant 0 : i32
    %c0_i32_2 = arith.constant 0 : i32
    return %c0_i32, %c0_i32_0, %c0_i32_1 : i32, i32, i32
  }
  func.func @transform_4(%arg0: i32) -> (i32, i32, i32) {
    %c0_i32 = arith.constant 0 : i32
    %c0_i32_0 = arith.constant 0 : i32
    %c0_i32_1 = arith.constant 0 : i32
    %c0_i32_2 = arith.constant 0 : i32
    return %c0_i32, %c0_i32_0, %c0_i32_1 : i32, i32, i32
  }
  func.func @transform_5(%arg0: i32) -> (i32, i32) {
    %c0_i32 = arith.constant 0 : i32
    %c0_i32_0 = arith.constant 0 : i32
    return %arg0, %c0_i32 : i32, i32
  }
  func.func @transform_6(%arg0: i32) -> (i32, i32) {
    %c0_i32 = arith.constant 0 : i32
    %c0_i32_0 = arith.constant 0 : i32
    return %arg0, %c0_i32 : i32, i32
  }
  func.func @transform_7(%arg0: i32) -> (i32, i32) {
    %c0_i32 = arith.constant 0 : i32
    %c0_i32_0 = arith.constant 0 : i32
    return %arg0, %c0_i32 : i32, i32
  }
}

</mosaic_0001>

<bundles_post_ra>
// kernel: tpu_custom_call.1
= control target key start
LH: loop header
LB: loop body
LE: loop exit
PB: predicated region body
PF: predicated region fallthrough
CT: control target
= control target key end

     0   :  { %13 = vsyncpa [#allocation3], 0  ;;  %s609_s0 = inlined_call_operand.hbm [shape: f32[16,32], index: 0, kind: input, shape index: {}]   ;;  %s610_s1 = inlined_call_operand.hbm [shape: f32[16,32], index: 1, kind: input, shape index: {}]   ;;  %s611_s2 = inlined_call_operand.hbm [shape: f32[16,32], index: 2, kind: input, shape index: {}]   ;;  %s612_s3 = inlined_call_operand.hbm [shape: bf16[3,32,32], index: 3, kind: input, shape index: {}]   ;;  %s613_s4 = inlined_call_operand.vmem [shape: f32[3,1,32], index: 4, kind: input, shape index: {}]   ;;  %s614_s5 = inlined_call_operand.hbm [shape: bf16[16,32], index: 5, kind: output, shape index: {0}]   ;;  %s615_s6 = inlined_call_operand.hbm [shape: bf16[16,32], index: 6, kind: output, shape index: {1}]   ;;  %s616_s7 = inlined_call_operand.hbm [shape: bf16[16,32], index: 7, kind: output, shape index: {2}]  }
   0x1   :  { %14 = vsyncpa [#allocation6], 0 }
   0x2   :  { %15 = vsyncpa [#allocation9], 0 }
   0x3   :  { %16 = vsyncpa [#allocation4], 0 }
   0x4   :  { %17 = vsyncpa [#allocation12], 0  ;;  %s35_s26 = sshll.u32 %s610_s1, 4  ;;  %s510_s27 = smov [#allocation5]   ;;  %s36_s26 = int_to_ptr.hbm [resolvable:$true] %s35_s26 }
   0x5   :  { %s37_s28 = sshll.u32 %s510_s27, 4  ;;  %s22_s8 = sshll.u32 %s609_s0, 4  ;;  %s38_s28 = int_to_ptr.vmem [resolvable:$true] %s37_s28  ;;  %s23_s8 = int_to_ptr.hbm [resolvable:$true] %s22_s8 }
   0x6   :  { %s511_s9 = smov 128   ;;  %s512_s10 = smov 8  }
   0x7   :  { %43 = dma.hbm_to_vmem [thread:$0]  %s36_s26, 256, %s38_s28, [#allocation6], %s511_s9, %s511_s9, %s512_s10  }
   0x8   :  { %s513_s11 = smov [#allocation2]   ;;  %s48_s15 = sshll.u32 %s611_s2, 4  ;;  %s49_s15 = int_to_ptr.hbm [resolvable:$true] %s48_s15 }
   0x9   :  { %s24_s12 = sshll.u32 %s513_s11, 4  ;;  %s61_s17 = sshll.u32 %s612_s3, 4  ;;  %s25_s12 = int_to_ptr.vmem [resolvable:$true] %s24_s12  ;;  %s62_s17 = int_to_ptr.hbm [resolvable:$true] %s61_s17 }
   0xa   :  { %30 = dma.hbm_to_vmem [thread:$0]  %s23_s8, 256, %s25_s12, [#allocation3], %s511_s9, %s511_s9, %s512_s10  }
   0xb   :  { %s514_s18 = smov [#allocation7]   ;;  %s515_s0 = smov [#allocation8]  }
   0xc   :  { %s50_s19 = sshll.u32 %s514_s18, 4  ;;  %s63_s20 = sshll.u32 %s515_s0, 4  ;;  %s51_s19 = int_to_ptr.vmem [resolvable:$true] %s50_s19  ;;  %s64_s20 = int_to_ptr.vmem [resolvable:$true] %s63_s20 }
   0xd   :  { %56 = dma.hbm_to_vmem [thread:$0]  %s49_s15, 256, %s51_s19, [#allocation6], %s511_s9, %s511_s9, %s512_s10  }
   0xe   :  { %s516_s21 = smov 64   ;;  %s517_s22 = smov 4  }
   0xf   :  { %69 = dma.hbm_to_vmem [thread:$0]  %s62_s17, 768, %s64_s20, [#allocation9], %s516_s21, %s516_s21, %s517_s22  }
  0x10   :  { %500 = dma.done.wait [#allocation3], 256  }
  0x11   :  { %501 = vsyncadd [#allocation3], 4294967040 }
  0x12   :  { %502 = dma.done.wait [#allocation6], 512  }
  0x13   :  { %503 = vsyncadd [#allocation6], 4294966784 }
  0x14   :  { %504 = dma.done.wait [#allocation9], 768  }
  0x15   :  { %505 = vsyncadd [#allocation9], 4294966528  ;;  %v313_v0 = vld [vmem:[#allocation8 + $0x8] sm:$0xff]  ;;  %v315_v1 = vld [vmem:[#allocation8 + $0x18] sm:$0xff]  ;;  %vm112_vm0 = vcmask 261120   ;;  %vm132_vm1 = vcmask 257024  }
  0x16   :  { %v317_v2 = vld [vmem:[#allocation8 + $0x28] sm:$0xff]  ;;  %v312_v3 = vld [vmem:[#allocation8] sm:$0xff]  ;;  %v314_v4 = vld [vmem:[#allocation8 + $0x10] sm:$0xff]  ;;  %122 = vmatpush.bf16.msra.mxu0 %v313_v0  ;;  %169 = vmatpush.bf16.msra.mxu1 %v315_v1  ;;  %s518_s27 = smov [#allocation10]   ;;  %s233_s8 = sshll.u32 %s614_s5, 4  ;;  %s234_s8 = int_to_ptr.hbm [resolvable:$true] %s233_s8 }
  0x17   :  { %v316_v5 = vld [vmem:[#allocation8 + $0x20] sm:$0xff]  ;;  %v89_v6 = vld [vmem:[#allocation2] sm:$0xff]  ;;  %v90_v7 = vld [vmem:[#allocation2 + $0x8] sm:$0xff]  ;;  %215 = vmatpush.bf16.msra.mxu2 %v317_v2  ;;  %s231_s28 = sshll.u32 %s518_s27, 4  ;;  %s519_s9 = smov [#allocation11]   ;;  %s232_s28 = int_to_ptr.vmem [resolvable:$true] %s231_s28 }
  0x18   :  { %v135_v8 = vld [vmem:[#allocation5] sm:$0xff]  ;;  %v136_v9 = vld [vmem:[#allocation5 + $0x8] sm:$0xff]  ;;  %v181_v10 = vld [vmem:[#allocation7] sm:$0xff]  ;;  %v91_v12 = vpack.c.bf16 %v90_v7, %v89_v6  ;;  %s244_s10 = sshll.u32 %s519_s9, 4  ;;  %s246_s12 = sshll.u32 %s615_s6, 4  ;;  %s245_s10 = int_to_ptr.vmem [resolvable:$true] %s244_s10  ;;  %s247_s12 = int_to_ptr.hbm [resolvable:$true] %s246_s12 }
  0x19   :  { %v182_v11 = vld [vmem:[#allocation7 + $0x8] sm:$0xff]  ;;  %v137_v13 = vpack.c.bf16 %v136_v9, %v135_v8  ;;  %v329_v15 = vld [vmem:[%s613_s4] ss:$0 sm:$0xff]  ;;  %v330_v16 = vld [vmem:[%s613_s4 + $0x1] ss:$0 sm:$0xff]  ;;  %s520_s5 = smov [#allocation13]  }
  0x1a   :  { %123 = vmatpush.bf16.msra.mxu0 %v312_v3  ;;  %170 = vmatpush.bf16.msra.mxu1 %v314_v4  ;;  %v183_v14 = vpack.c.bf16 %v182_v11, %v181_v10  ;;  %v331_v23 = vld [vmem:[%s613_s4 + $0x2] ss:$0 sm:$0xff]  ;;  %s257_s13 = sshll.u32 %s520_s5, 4  ;;  %s259_s1 = sshll.u32 %s616_s7, 4  ;;  %s258_s13 = int_to_ptr.vmem [resolvable:$true] %s257_s13  ;;  %s260_s1 = int_to_ptr.hbm [resolvable:$true] %s259_s1 }
  0x1b   :  { %216 = vmatpush.bf16.msra.mxu2 %v316_v5 }
  0x1d   :  { %291 = vmatmul.msk.bf16.vlgmr.msra.gmra.mxu0 %vm112_vm0, %v91_v12  ;;  %301 = vmatmul.msk.bf16.vlgmr.msra.gmra.mxu1 %vm112_vm0, %v137_v13 }
  0x1e   :  { %311 = vmatmul.msk.bf16.vlgmr.msra.gmra.mxu2 %vm112_vm0, %v183_v14 }
  0x9a   :  { %v125_v17 = vpop.f32.mrf.mxu0  ;;  %v172_v18 = vpop.f32.mrf.mxu1 }
  0x9b   :  { %v126_v19 = vadd.f32 %v329_v15, %v125_v17  ;;  %v173_v20 = vadd.f32 %v330_v16, %v172_v18 }
  0x9d   :  { %v130_v21 = vpack.c.bf16 %v126_v19, %v126_v19  ;;  %v177_v22 = vpack.c.bf16 %v173_v20, %v173_v20 }
  0x9f   :  { %133 = vst.msk [vmem:[#allocation10] sm:$0xf] %vm132_vm1, %v130_v21 }
  0xa0   :  { %179 = vst.msk [vmem:[#allocation11] sm:$0xf] %vm132_vm1, %v177_v22 }
  0xa1   :  { %v218_v24 = vpop.f32.mrf.mxu2 }
  0xa2   :  { %v219_v25 = vadd.f32 %v331_v23, %v218_v24  ;;  %v127_v26 = vpop.f32.mrf.mxu0  ;;  %v174_v27 = vpop.f32.mrf.mxu1 }
  0xa3   :  { %v128_v28 = vadd.f32 %v329_v15, %v127_v26  ;;  %v175_v29 = vadd.f32 %v330_v16, %v174_v27 }
  0xa4   :  { %v223_v30 = vpack.c.bf16 %v219_v25, %v219_v25 }
  0xa5   :  { %v131_v31 = vpack.c.bf16 %v128_v28, %v128_v28  ;;  %v178_v32 = vpack.c.bf16 %v175_v29, %v175_v29 }
  0xa6   :  { %225 = vst.msk [vmem:[#allocation13] sm:$0xf] %vm132_vm1, %v223_v30 }
  0xa7   :  { %134 = vst.msk [vmem:[#allocation10 + $0x4] sm:$0xf] %vm132_vm1, %v131_v31 }
  0xa8   :  { %180 = vst.msk [vmem:[#allocation11 + $0x4] sm:$0xf] %vm132_vm1, %v178_v32  ;;  %239 = dma.vmem_to_hbm [thread:$0]  %s232_s28, 128, %s234_s8, [#allocation4], %s516_s21, %s516_s21, %s517_s22  }
  0xa9   :  { %v220_v33 = vpop.f32.mrf.mxu2  ;;  %252 = dma.vmem_to_hbm [thread:$0]  %s245_s10, 128, %s247_s12, [#allocation12], %s516_s21, %s516_s21, %s517_s22  }
  0xaa   :  { %v221_v34 = vadd.f32 %v331_v23, %v220_v33 }
  0xac   :  { %v224_v35 = vpack.c.bf16 %v221_v34, %v221_v34 }
  0xae   :  { %226 = vst.msk [vmem:[#allocation13 + $0x4] sm:$0xf] %vm132_vm1, %v224_v35 }
  0xaf   :  { %265 = dma.vmem_to_hbm [thread:$0]  %s258_s13, 128, %s260_s1, [#allocation12], %s516_s21, %s516_s21, %s517_s22  }
  0xb0   :  { %506 = dma.done.wait [#allocation4], 128  }
  0xb1   :  { %507 = vsyncadd [#allocation4], 4294967168 }
  0xb2   :  { %508 = dma.done.wait [#allocation12], 256  }
  0xb3   :  { %509 = vsyncadd [#allocation12], 4294967040 }
  0xb4   :  { %278 = vsyncpa [#allocation3], 1 }
  0xb5   :  { %279 = vsyncpa [#allocation6], 1 }
  0xb6   :  { %280 = vsyncpa [#allocation9], 1 }
  0xb7   :  { %281 = vsyncpa [#allocation4], 1 }
  0xb8   :  { %282 = vsyncpa [#allocation12], 1 }

</bundles_post_ra>
